<compile_context>
chip_gen: v7x
topology: tpu7x:2x2x1
jax: 0.10.0
libtpu: 0.0.40
codegen_flags: <defaults>
</compile_context>

<pallas_src>
import math

import jax
import jax.numpy as jnp
from jax.experimental import pallas as pl
from jax.experimental.pallas import tpu as pltpu

_LANES = (1024, 512, 256, 128)   # preferred lane-dense widths (multiples of 128)
_MAX_BLOCK_ROWS = 1024           # 1024x1024: 1 MiB u8 in + 4 MiB f32 out / block
_TARGET_BLOCK_ELEMS = 1 << 20    # ~1M elems per grid step (~5 MiB HBM traffic)
_MIN_SPLIT_ROWS = 32             # split into >=2 parallel blocks above 2*this
_SMALL_N = 256 * 1024            # below this, plain fused XLA is faster
_INV_255 = 1.0 / 255.0


def _round_up(x, m):
    return ((x + m - 1) // m) * m


def _normalize_kernel(x_ref, o_ref):
    # x_ref: (block_rows, width) uint8 block; o_ref: same block, float dtype.
    # Reproduces: outer_state.astype(float) / 255.0 as a pure VPU multiply.
    o_ref[...] = (x_ref[...].astype(jnp.float32)
                  * jnp.float32(_INV_255)).astype(o_ref.dtype)


def _normalize_2d(x2d, out_dtype):
    """Run the normalization kernel over a 2-D uint8 slab (rows, width)."""
    rows, width = x2d.shape

    # Rows per block: ~1M elements per step, rows a multiple of 32 (uint8
    # sublane alignment) unless the block is the full row extent.
    block_rows = min(rows,
                     min(_round_up(max(1, _TARGET_BLOCK_ELEMS // width), 32),
                         max(_MAX_BLOCK_ROWS,
                             _round_up(max(1, _TARGET_BLOCK_ELEMS // width), 32))))
    block_rows = min(rows, max(32, min(block_rows, 8 * _MAX_BLOCK_ROWS)))
    # If the whole slab would be a single block but it is big enough, split it
    # into >= 2 "parallel" blocks so both v7x TensorCores stream DMAs.
    if block_rows >= rows and rows >= 2 * _MIN_SPLIT_ROWS:
        block_rows = min(rows, _round_up(pl.cdiv(rows, 2), 32))

    grid = (pl.cdiv(rows, block_rows),)
    return pl.pallas_call(
        _normalize_kernel,
        out_shape=jax.ShapeDtypeStruct((rows, width), out_dtype),
        grid=grid,
        in_specs=[pl.BlockSpec((block_rows, width), lambda i: (i, 0))],
        out_specs=pl.BlockSpec((block_rows, width), lambda i: (i, 0)),
        compiler_params=pltpu.CompilerParams(
            dimension_semantics=("parallel",)),
    )(x2d)


def normalize_outer_state(outer_state_u8, out_dtype=jnp.float32,
                          force_pallas=False):
    """Pallas-accelerated `outer_state.astype(float) / 255.0` for uint8 input.

    out_dtype=jnp.bfloat16 halves the write traffic if downstream consumers
    take bf16 activations (review suggestion); default float32 matches the
    PyTorch reference (computed in f64 there; f32 here).
    """
    x = jnp.asarray(outer_state_u8)
    orig_shape = x.shape
    n = math.prod(orig_shape) if orig_shape else 1

    # Tiny inputs: a fused XLA cast+multiply beats kernel dispatch overhead.
    if x.ndim == 0 or n == 0 or (n < _SMALL_N and not force_pallas):
        return (x.astype(jnp.float32) * jnp.float32(_INV_255)).astype(out_dtype)

    # Path A: lane-dense factorization (trailing width multiple of 128).
    # Reshape of a contiguous array is free layout plumbing; no pad / slice.
    for lane in _LANES:
        if n % lane == 0:
            x2d = x.reshape(n // lane, lane)
            return _normalize_2d(x2d, out_dtype).reshape(orig_shape)

    # Path B: no 128-aligned factorization exists.  Keep the full trailing dim
    # as the block width (masked stores) instead of paying pad + [:n] slice
    # HBM round trips.
    last = orig_shape[-1]
    x2d = x.reshape(n // last, last)
    return _normalize_2d(x2d, out_dtype).reshape(orig_shape)


class SecondLevelAgent:
    """JAX port of Second_Level_Agent's in-module compute."""

    def __init__(self, n_actions, noop_action=True, first_level_a_dim=8,
                 temporal_ratio=5):
        self._n_actions = n_actions + int(noop_action)
        self._first_level_a_dim = first_level_a_dim
        self._noop = noop_action
        self._temporal_ratio = temporal_ratio
        # TODO(synk): second_level_architecture and first_level_actor are
        # external submodules with unspecified architectures; their
        # sample_action() calls have no in-module definition to translate.

    def forward(self, states):
        # Exact semantics of the PyTorch forward(): `pass` -> returns None.
        return None

    def observe_second_level_state(self, state):
        inner_state = jnp.asarray(state["inner_state"], dtype=jnp.float32)
        outer_state = normalize_outer_state(state["outer_state"])
        return inner_state, outer_state

    def observe_first_level_state(self, state):
        return jnp.asarray(state["first_level_obs"], dtype=jnp.float32)

    def observe_state(self, state):
        inner_state, outer_state = self.observe_second_level_state(state)
        first_level_obs = self.observe_first_level_state(state)
        return inner_state, outer_state, first_level_obs

    def noop_first_level_action(self):
        # The `if self._noop and action == n_actions - 1` branch of
        # sample_first_level_action.
        return jnp.zeros((self._first_level_a_dim,), dtype=jnp.float32)


if __name__ == "__main__":
    key = jax.random.PRNGKey(0)
    k_inner, k_outer, k_obs = jax.random.split(key, 3)

    B, C, H, W = 2, 4, 16, 16      # small NCHW image observation
    INNER_DIM = 32
    FIRST_LEVEL_OBS_DIM = 16

    outer_u8 = jax.random.randint(k_outer, (B, C, H, W), 0, 256,
                                  dtype=jnp.int32).astype(jnp.uint8)
    state = {
        "inner_state": jax.random.normal(k_inner, (B, INNER_DIM),
                                         dtype=jnp.float32),
        "outer_state": outer_u8,
        "first_level_obs": jax.random.normal(k_obs, (B, FIRST_LEVEL_OBS_DIM),
                                             dtype=jnp.float32),
    }

    agent = SecondLevelAgent(n_actions=6, noop_action=True,
                             first_level_a_dim=8)

    # forward() is a no-op, exactly like the PyTorch module.
    assert agent.forward(state) is None

    # Agent path: tiny input -> fused-XLA fallback (production dispatch rule).
    inner_state, outer_state, first_level_obs = agent.observe_state(state)
    jax.block_until_ready(outer_state)
    ref = outer_u8.astype(jnp.float32) / 255.0
    assert outer_state.shape == (B, C, H, W) and outer_state.dtype == jnp.float32
    assert jnp.allclose(outer_state, ref, atol=1e-6)

    # Exercise the Pallas kernel on the same small input (lane-dense path,
    # 2048 elems -> single (2, 1024) block).
    outer_pallas = normalize_outer_state(outer_u8, force_pallas=True)
    jax.block_until_ready(outer_pallas)
    assert outer_pallas.shape == (B, C, H, W)
    assert outer_pallas.dtype == jnp.float32
    assert jnp.allclose(outer_pallas, ref, atol=1e-6)

    # Medium aligned input: exercises the multi-block "parallel" grid path.
    med_u8 = jax.random.randint(jax.random.PRNGKey(1), (2, 4, 64, 128),
                                0, 256, dtype=jnp.int32).astype(jnp.uint8)
    med_out = normalize_outer_state(med_u8, force_pallas=True)
    jax.block_until_ready(med_out)
    assert jnp.allclose(med_out, med_u8.astype(jnp.float32) / 255.0, atol=1e-6)

    # Unaligned input (n not a multiple of 128): full-trailing-dim block
    # fallback, no pad / slice copies.
    odd_u8 = jax.random.randint(jax.random.PRNGKey(2), (2, 3, 20, 20),
                                0, 256, dtype=jnp.int32).astype(jnp.uint8)
    odd_out = normalize_outer_state(odd_u8, force_pallas=True)
    jax.block_until_ready(odd_out)
    assert jnp.allclose(odd_out, odd_u8.astype(jnp.float32) / 255.0, atol=1e-6)

    assert inner_state.shape == (B, INNER_DIM)
    assert first_level_obs.shape == (B, FIRST_LEVEL_OBS_DIM)
    assert agent.noop_first_level_action().shape == (8,)

    print("KERNEL_OK")
</pallas_src>

<mosaic_0001>
module attributes {stable_mosaic.version = 11 : i64} {
  func.func @_normalize_kernel(%arg0: i32, %arg1: memref<2x1024xi8, #tpu.memory_space<vmem>>, %arg2: memref<2x1024xf32, #tpu.memory_space<vmem>>) attributes {dimension_semantics = [#tpu.dimension_semantics<parallel>], iteration_bounds = array<i64: 1>, scalar_prefetch = 0 : i64, scratch_operands = 0 : i64, tpu.core_type = #tpu.core_type<tc>, window_params = [{transform_indices = @transform_0, window_bounds = array<i64: 2, 1024>}, {transform_indices = @transform_1, window_bounds = array<i64: 2, 1024>}]} {
    %c0 = arith.constant 0 : index
    %c0_0 = arith.constant 0 : index
    %0 = vector.load %arg1[%c0, %c0_0] : memref<2x1024xi8, #tpu.memory_space<vmem>>, vector<2x1024xi8>
    %1 = arith.uitofp %0 : vector<2x1024xi8> to vector<2x1024xf32>
    %cst = arith.constant 0.00392156886 : f32
    %2 = vector.broadcast %cst : f32 to vector<2x1024xf32>
    %3 = arith.mulf %1, %2 : vector<2x1024xf32>
    %c0_1 = arith.constant 0 : index
    %c0_2 = arith.constant 0 : index
    %4 = vector.load %arg2[%c0_1, %c0_2] : memref<2x1024xf32, #tpu.memory_space<vmem>>, vector<2x1024xf32>
    tpu.vector_store %arg2[%c0_1, %c0_2], %3 {strides = array<i32>} : memref<2x1024xf32, #tpu.memory_space<vmem>>, vector<2x1024xf32>,
    return
  }
  func.func @transform_0(%arg0: i32) -> (i32, i32) {
    %c0_i32 = arith.constant 0 : i32
    %c0_i32_0 = arith.constant 0 : i32
    return %arg0, %c0_i32 : i32, i32
  }
  func.func @transform_1(%arg0: i32) -> (i32, i32) {
    %c0_i32 = arith.constant 0 : i32
    %c0_i32_0 = arith.constant 0 : i32
    return %arg0, %c0_i32 : i32, i32
  }
}

</mosaic_0001>

<bundles_post_ra>
// kernel: tpu_custom_call.1
= control target key start
LH: loop header
LB: loop body
LE: loop exit
PB: predicated region body
PF: predicated region fallthrough
CT: control target
= control target key end

     0   :  { %6 = vsyncpa [#allocation3], 0  ;;  %s179_s0 = inlined_call_operand.hbm [shape: u8[2,1024], index: 0, kind: input, shape index: {}]   ;;  %s180_s1 = inlined_call_operand.hbm [shape: f32[2,1024], index: 1, kind: output, shape index: {}]  }
   0x1   :  { %7 = vsyncpa [#allocation4], 0  ;;  %s142_s6 = smov [#allocation2]   ;;  %s94_s10 = scalar_lea.hbm %s179_s0, 128 }
   0x2   :  { %s14_s7 = sshll.u32 %s142_s6, 4  ;;  %p95_p0 = scmp.ne.s32.totalorder %s179_s0, %s94_s10  ;;  %s15_s7 = int_to_ptr.vmem [resolvable:$true] %s14_s7 }
   0x3   :  { %p98_p1 = scmp.lt.u32.totalorder %s94_s10, %s179_s0 }
   0x5   :  { %p100_p2 = pnand %p98_p1, %p95_p0 }
   0x7   :  { %103 = shalt.err (!%p100_p2)
}
   0x8   :  { %s104_s15 = scalar_lea.vmem %s15_s7, 128  ;;  %p109_p4 = scmp.lt.s32.totalorder %s15_s7, %s15_s7 }
   0x9   :  { %p105_p3 = scmp.ne.s32.totalorder %s15_s7, %s104_s15  ;;  %p110_p5 = scmp.lt.s32.totalorder %s104_s15, %s104_s15 }
   0xb   :  { %p111_p6 = por %p110_p5, %p109_p4 }
   0xd   :  { %p112_p7 = pnand %p111_p6, %p105_p3 }
   0xf   :  { %115 = shalt.err (!%p112_p7)
}
  0x10   :  { %17 = dma.hbm_to_vmem [thread:$0]  %s179_s0, 128, %s15_s7, [#allocation3]  }
  0x11   :  { %138 = dma.done.wait [#allocation3], 128  }
  0x12   :  { %139 = vsyncadd [#allocation3], 4294967168  ;;  %v143_v0 = vmov 1983009808   ;;  %v45_v2 = vlaneseq  ;;  %v21_v3 = vld [vmem:[#allocation2] sm:$0xff]  ;;  %s144_s0 = smov [#allocation5]  }
  0x13   :  { %v43_v1 = vunpack.c.l.s4 %v143_v0  ;;  %v22_v6 = vunpack.c.0.s8 %v21_v3  ;;  %v23_v7 = vunpack.c.1.s8 %v21_v3  ;;  %v24_v8 = vunpack.c.2.s8 %v21_v3  ;;  %s82_s18 = sshll.u32 %s144_s0, 4  ;;  %s83_s18 = int_to_ptr.vmem [resolvable:$true] %s82_s18 }
  0x14   :  { %v46_v5 = vshrl.u32 %v45_v2, 7  ;;  %v25_v9 = vunpack.c.3.s8 %v21_v3  ;;  %s116_s19 = scalar_lea.vmem %s83_s18, 256  ;;  %p121_p9 = scmp.lt.s32.totalorder %s83_s18, %s83_s18 }
  0x15   :  { %v44_v4 = vunpack.c.0.s8 %v43_v1  ;;  %v26_v10 = vand.u32 255, %v22_v6  ;;  %v27_v11 = vand.u32 255, %v23_v7  ;;  %v28_v12 = vand.u32 255, %v24_v8  ;;  %p117_p8 = scmp.ne.s32.totalorder %s83_s18, %s116_s19  ;;  %p122_p10 = scmp.lt.s32.totalorder %s116_s19, %s116_s19 }
  0x16   :  { %v29_v13 = vand.u32 255, %v25_v9 }
  0x17   :  { %v47_v14 = vsub.s32 %v44_v4, %v46_v5  ;;  %v30_v15 = vcvt.s32.f32 %v26_v10  ;;  %v31_v16 = vcvt.s32.f32 %v27_v11  ;;  %v32_v17 = vcvt.s32.f32 %v28_v12  ;;  %p123_p11 = por %p122_p10, %p121_p9 }
  0x18   :  { %v33_v18 = vcvt.s32.f32 %v29_v13 }
  0x19   :  { %v34_v19 = vmul.f32 0.003921569, %v30_v15  ;;  %v35_v20 = vmul.f32 0.003921569, %v31_v16  ;;  %v36_v21 = vmul.f32 0.003921569, %v32_v17  ;;  %p124_p12 = pnand %p123_p11, %p117_p8 }
  0x1a   :  { %v37_v22 = vmul.f32 0.003921569, %v33_v18 }
  0x1b   :  { %v48_v23 = vrot.slane %v34_v19, %v47_v14  ;;  %v55_v24 = vrot.slane %v35_v20, %v47_v14  ;;  %v63_v25 = vrot.slane %v36_v21, %v47_v14 }
  0x1c   :  { %v70_v26 = vrot.slane %v37_v22, %v47_v14 }
  0x1d   :  { %v56_v27 = vcombine.low %v48_v23, %v55_v24 }
  0x1e   :  { %v71_v28 = vcombine.low %v63_v25, %v70_v26 }
  0x1f   :  { %74 = vst [vmem:[#allocation5] sm:$0xff] %v56_v27 }
  0x20   :  { %75 = vst [vmem:[#allocation5 + $0x8] sm:$0xff] %v71_v28 }
  0x21   :  { %127 = shalt.err (!%p124_p12)
}
  0x22   :  { %s128_s22 = scalar_lea.hbm %s180_s1, 256 }
  0x23   :  { %p129_p13 = scmp.ne.s32.totalorder %s180_s1, %s128_s22  ;;  %p132_p0 = scmp.lt.u32.totalorder %s128_s22, %s180_s1 }
  0x25   :  { %p134_p1 = pnand %p132_p0, %p129_p13 }
  0x27   :  { %137 = shalt.err (!%p134_p1)
}
  0x28   :  { %85 = dma.vmem_to_hbm [thread:$0]  %s83_s18, 256, %s180_s1, [#allocation4]  }
  0x29   :  { %140 = dma.done.wait [#allocation4], 256  }
  0x2a   :  { %141 = vsyncadd [#allocation4], 4294967040 }
  0x2b   :  { %89 = vsyncpa [#allocation3], 1 }
  0x2c   :  { %90 = vsyncpa [#allocation4], 1 }

</bundles_post_ra>
